<compile_context>
chip_gen: v7x
topology: tpu7x:2x2x1
jax: 0.10.0
libtpu: 0.0.40
codegen_flags: <defaults>
</compile_context>

<pallas_src>
import jax
import jax.numpy as jnp
from jax.experimental import pallas as pl
from jax.experimental.pallas import tpu as pltpu


def _mlp_kernel(x_ref, w1_ref, b1_ref, w2_ref, b2_ref, o_ref):
    # fc1: (TB, in) @ (in, hid) -> f32 accum on the MXU
    h = jnp.dot(x_ref[...], w1_ref[...], preferred_element_type=jnp.float32)
    h = h + b1_ref[...].astype(jnp.float32)      # bias add in f32 (VPU)
    h = jnp.maximum(h, 0.0)                      # ReLU in f32 (VPU)
    # fc2: (TB, hid) @ (hid, out_padded) -> f32 accum (cast h to weight dtype for MXU)
    y = jnp.dot(h.astype(w2_ref.dtype), w2_ref[...],
                preferred_element_type=jnp.float32)
    y = y + b2_ref[...].astype(jnp.float32)
    o_ref[...] = y.astype(o_ref.dtype)           # lane-dense, unmasked store


def _round_up(n, m):
    return ((n + m - 1) // m) * m


def transformation_forward(x, w1, b1, w2, b2, *, block_batch=512):
    """x: (B, input_dim); w1: (input_dim, hidden); b1: (hidden,);
       w2: (hidden, output_dim); b2: (output_dim,)"""
    B, input_dim = x.shape
    hidden_dim = w1.shape[1]
    output_dim = w2.shape[1]

    # --- lane-dense output: pad output columns (zeros) to a multiple of 128 ---
    out_padded = _round_up(output_dim, 128)
    if out_padded != output_dim:
        w2_p = jnp.pad(w2, ((0, 0), (0, out_padded - output_dim)))
        b2_p = jnp.pad(b2, ((0, out_padded - output_dim),))
    else:
        w2_p, b2_p = w2, b2

    # Keep biases 2D (1, N) so the last two dims map cleanly onto (sublane, lane).
    b1_2d = b1.reshape(1, hidden_dim)
    b2_2d = b2_p.reshape(1, out_padded)

    # Batch tile: multiple of 8 sublanes (f32), capped at block_batch rows.
    tb = min(block_batch, _round_up(B, 8))
    b_padded = _round_up(B, tb)
    x_p = x if b_padded == B else jnp.pad(x, ((0, b_padded - B), (0, 0)))
    grid = (b_padded // tb,)

    itemsize = x.dtype.itemsize
    cost = pl.CostEstimate(
        flops=2 * B * (input_dim * hidden_dim + hidden_dim * output_dim),
        transcendentals=0,
        bytes_accessed=(x.size * itemsize
                        + w1.size * w1.dtype.itemsize
                        + b1.size * b1.dtype.itemsize
                        + w2.size * w2.dtype.itemsize
                        + b2.size * b2.dtype.itemsize
                        + B * output_dim * itemsize),
    )

    out = pl.pallas_call(
        _mlp_kernel,
        out_shape=jax.ShapeDtypeStruct((b_padded, out_padded), x.dtype),
        grid=grid,
        in_specs=[
            # x: one (tb, input_dim) tile per grid step (pipelined DMA).
            pl.BlockSpec((tb, input_dim), lambda i: (i, 0)),
            # Weights / biases: same block every step -> resident in VMEM, DMA'd once.
            pl.BlockSpec((input_dim, hidden_dim), lambda i: (0, 0),
                         memory_space=pltpu.MemorySpace.VMEM),
            pl.BlockSpec((1, hidden_dim), lambda i: (0, 0),
                         memory_space=pltpu.MemorySpace.VMEM),
            pl.BlockSpec((hidden_dim, out_padded), lambda i: (0, 0),
                         memory_space=pltpu.MemorySpace.VMEM),
            pl.BlockSpec((1, out_padded), lambda i: (0, 0),
                         memory_space=pltpu.MemorySpace.VMEM),
        ],
        out_specs=pl.BlockSpec((tb, out_padded), lambda i: (i, 0)),
        compiler_params=pltpu.CompilerParams(
            # Batch-tile steps are independent -> shardable across v7x's 2 TCs.
            dimension_semantics=("parallel",),
        ),
        cost_estimate=cost,
    )(x_p, w1, b1_2d, w2_p, b2_2d)

    if b_padded != B or out_padded != output_dim:
        out = out[:B, :output_dim]
    return out


def init_params(key, input_dim, hidden_dim, output_dim, dtype=jnp.float32):
    """Deterministic init mirroring nn.Linear's uniform(-1/sqrt(fan_in), 1/sqrt(fan_in))."""
    k1, k2, k3, k4 = jax.random.split(key, 4)
    bound1 = 1.0 / (input_dim ** 0.5)
    bound2 = 1.0 / (hidden_dim ** 0.5)
    w1 = jax.random.uniform(k1, (input_dim, hidden_dim), dtype, -bound1, bound1)
    b1 = jax.random.uniform(k2, (hidden_dim,), dtype, -bound1, bound1)
    w2 = jax.random.uniform(k3, (hidden_dim, output_dim), dtype, -bound2, bound2)
    b2 = jax.random.uniform(k4, (output_dim,), dtype, -bound2, bound2)
    return w1, b1, w2, b2


if __name__ == "__main__":
    # Small shapes consistent with the module: batch=8, input_dim=32, hidden=64, output=32.
    batch, input_dim, hidden_dim, output_dim = 8, 32, 64, 32

    key = jax.random.PRNGKey(0)
    kx, kp = jax.random.split(key)
    x = jax.random.normal(kx, (batch, input_dim), jnp.float32)
    w1, b1, w2, b2 = init_params(kp, input_dim, hidden_dim, output_dim)

    fwd = jax.jit(transformation_forward)
    y = fwd(x, w1, b1, w2, b2)
    y = jax.block_until_ready(y)

    # Pure-JAX reference check (silent).
    ref = jnp.maximum(x @ w1 + b1, 0.0) @ w2 + b2
    assert y.shape == (batch, output_dim)
    assert jnp.allclose(y, ref, atol=1e-5, rtol=1e-5)

    print("KERNEL_OK")
</pallas_src>

<mosaic_0001>
module attributes {stable_mosaic.version = 11 : i64} {
  func.func @_mlp_kernel(%arg0: i32, %arg1: memref<8x32xf32, #tpu.memory_space<vmem>>, %arg2: memref<32x64xf32, #tpu.memory_space<vmem>>, %arg3: memref<1x64xf32, #tpu.memory_space<vmem>>, %arg4: memref<64x128xf32, #tpu.memory_space<vmem>>, %arg5: memref<1x128xf32, #tpu.memory_space<vmem>>, %arg6: memref<8x128xf32, #tpu.memory_space<vmem>>) attributes {dimension_semantics = [#tpu.dimension_semantics<parallel>], iteration_bounds = array<i64: 1>, scalar_prefetch = 0 : i64, scratch_operands = 0 : i64, tpu.core_type = #tpu.core_type<tc>, window_params = [{transform_indices = @transform_0, window_bounds = array<i64: 8, 32>}, {pipeline_mode = #tpu.pipeline_mode<synchronous>, transform_indices = @transform_1, window_bounds = array<i64: 32, 64>}, {pipeline_mode = #tpu.pipeline_mode<synchronous>, transform_indices = @transform_2, window_bounds = array<i64: 1, 64>}, {pipeline_mode = #tpu.pipeline_mode<synchronous>, transform_indices = @transform_3, window_bounds = array<i64: 64, 128>}, {pipeline_mode = #tpu.pipeline_mode<synchronous>, transform_indices = @transform_4, window_bounds = array<i64: 1, 128>}, {transform_indices = @transform_5, window_bounds = array<i64: 8, 128>}]} {
    %c0 = arith.constant 0 : index
    %c0_0 = arith.constant 0 : index
    %0 = vector.load %arg1[%c0, %c0_0] : memref<8x32xf32, #tpu.memory_space<vmem>>, vector<8x32xf32>
    %c0_1 = arith.constant 0 : index
    %c0_2 = arith.constant 0 : index
    %1 = vector.load %arg2[%c0_1, %c0_2] : memref<32x64xf32, #tpu.memory_space<vmem>>, vector<32x64xf32>
    %cst = arith.constant dense<0.000000e+00> : vector<8x64xf32>
    %2 = tpu.matmul %0, %1, %cst {dimension_numbers = #tpu.dot_dimension_numbers<[1], [0], [0], [1], [0, 0, 1, 1], [], []>} : vector<8x32xf32>, vector<32x64xf32>, vector<8x64xf32> -> vector<8x64xf32>
    %c0_3 = arith.constant 0 : index
    %c0_4 = arith.constant 0 : index
    %3 = vector.load %arg3[%c0_3, %c0_4] : memref<1x64xf32, #tpu.memory_space<vmem>>, vector<1x64xf32>
    %4 = vector.broadcast %3 : vector<1x64xf32> to vector<8x64xf32>
    %5 = arith.addf %2, %4 : vector<8x64xf32>
    %cst_5 = arith.constant 0.000000e+00 : f32
    %6 = vector.broadcast %cst_5 : f32 to vector<8x64xf32>
    %7 = arith.maximumf %5, %6 : vector<8x64xf32>
    %c0_6 = arith.constant 0 : index
    %c0_7 = arith.constant 0 : index
    %8 = vector.load %arg4[%c0_6, %c0_7] : memref<64x128xf32, #tpu.memory_space<vmem>>, vector<64x128xf32>
    %cst_8 = arith.constant dense<0.000000e+00> : vector<8x128xf32>
    %9 = tpu.matmul %7, %8, %cst_8 {dimension_numbers = #tpu.dot_dimension_numbers<[1], [0], [0], [1], [0, 0, 1, 1], [], []>} : vector<8x64xf32>, vector<64x128xf32>, vector<8x128xf32> -> vector<8x128xf32>
    %c0_9 = arith.constant 0 : index
    %c0_10 = arith.constant 0 : index
    %10 = vector.load %arg5[%c0_9, %c0_10] : memref<1x128xf32, #tpu.memory_space<vmem>>, vector<1x128xf32>
    %11 = vector.broadcast %10 : vector<1x128xf32> to vector<8x128xf32>
    %12 = arith.addf %9, %11 : vector<8x128xf32>
    %c0_11 = arith.constant 0 : index
    %c0_12 = arith.constant 0 : index
    %13 = vector.load %arg6[%c0_11, %c0_12] : memref<8x128xf32, #tpu.memory_space<vmem>>, vector<8x128xf32>
    tpu.vector_store %arg6[%c0_11, %c0_12], %12 {strides = array<i32>} : memref<8x128xf32, #tpu.memory_space<vmem>>, vector<8x128xf32>,
    return
  }
  func.func @transform_0(%arg0: i32) -> (i32, i32) {
    %c0_i32 = arith.constant 0 : i32
    %c0_i32_0 = arith.constant 0 : i32
    return %arg0, %c0_i32 : i32, i32
  }
  func.func @transform_1(%arg0: i32) -> (i32, i32) {
    %c0_i32 = arith.constant 0 : i32
    %c0_i32_0 = arith.constant 0 : i32
    %c0_i32_1 = arith.constant 0 : i32
    return %c0_i32, %c0_i32_0 : i32, i32
  }
  func.func @transform_2(%arg0: i32) -> (i32, i32) {
    %c0_i32 = arith.constant 0 : i32
    %c0_i32_0 = arith.constant 0 : i32
    %c0_i32_1 = arith.constant 0 : i32
    return %c0_i32, %c0_i32_0 : i32, i32
  }
  func.func @transform_3(%arg0: i32) -> (i32, i32) {
    %c0_i32 = arith.constant 0 : i32
    %c0_i32_0 = arith.constant 0 : i32
    %c0_i32_1 = arith.constant 0 : i32
    return %c0_i32, %c0_i32_0 : i32, i32
  }
  func.func @transform_4(%arg0: i32) -> (i32, i32) {
    %c0_i32 = arith.constant 0 : i32
    %c0_i32_0 = arith.constant 0 : i32
    %c0_i32_1 = arith.constant 0 : i32
    return %c0_i32, %c0_i32_0 : i32, i32
  }
  func.func @transform_5(%arg0: i32) -> (i32, i32) {
    %c0_i32 = arith.constant 0 : i32
    %c0_i32_0 = arith.constant 0 : i32
    return %arg0, %c0_i32 : i32, i32
  }
}

</mosaic_0001>

<bundles_post_ra>
// kernel: transformation_forward.1
= control target key start
LH: loop header
LB: loop body
LE: loop exit
PB: predicated region body
PF: predicated region fallthrough
CT: control target
= control target key end

     0   :  { %v306_v3 = vmov 0.0|0.0   ;;  %vm307_vm0 = vmmov 0   ;;  %v308_v6 = vmov 0.0   ;;  %s397_s0 = inlined_call_operand.vmem [shape: f32[8,32], index: 0, kind: input, shape index: {}]   ;;  %s398_s1 = inlined_call_operand.vmem [shape: f32[32,64], index: 1, kind: input, shape index: {}]   ;;  %s399_s2 = inlined_call_operand.vmem [shape: f32[1,64], index: 2, kind: input, shape index: {}]   ;;  %s400_s3 = inlined_call_operand.vmem [shape: f32[64,128], index: 3, kind: input, shape index: {}]   ;;  %s401_s4 = inlined_call_operand.vmem [shape: f32[1,128], index: 4, kind: input, shape index: {}]   ;;  %s402_s5 = inlined_call_operand.hbm [shape: f32[8,128], index: 5, kind: output, shape index: {}]  }
   0x1   :  { %v22_v0 = vld [vmem:[%s398_s1] sm:$0xff]  ;;  %v23_v1 = vld [vmem:[%s398_s1 + $0x8] sm:$0xff]  ;;  %v24_v2 = vld [vmem:[%s398_s1 + $0x10] sm:$0xff]  ;;  %260 = vmatprep.subr.bf16.mxu0 %v306_v3  ;;  %238 = vmatprep.mubr.msk.f32.mxu0 %vm307_vm0, %v308_v6 }
   0x2   :  { %v261_v4 = vpack.c.bf16 %v23_v1, %v22_v0  ;;  %v25_v5 = vld [vmem:[%s398_s1 + $0x18] sm:$0xff]  ;;  %v108_v7 = vld [vmem:[%s400_s3] sm:$0xff]  ;;  %266 = vmatprep.subr.bf16.mxu1 %v306_v3  ;;  %v109_v8 = vld [vmem:[%s400_s3 + $0x8] sm:$0xff]  ;;  %257 = vmatprep.mubr.msk.f32.mxu1 %vm307_vm0, %v308_v6 }
   0x3   :  { %v110_v9 = vld [vmem:[%s400_s3 + $0x10] sm:$0xff]  ;;  %v111_v10 = vld [vmem:[%s400_s3 + $0x18] sm:$0xff]  ;;  %v264_v11 = vpack.c.bf16 %v25_v5, %v24_v2  ;;  %v267_v12 = vpack.c.bf16 %v109_v8, %v108_v7 }
   0x4   :  { %262 = vmatpush3.bf16.msra.mxu0 %v261_v4 }
   0x5   :  { %263 = vmatprep.subr.bf16.mxu0 %v306_v3 }
   0x6   :  { %10 = vsyncpa [#allocation3], 0  ;;  %268 = vmatpush3.bf16.msra.mxu1 %v267_v12  ;;  %v270_v13 = vpack.c.bf16 %v111_v10, %v110_v9  ;;  %v112_v14 = vld [vmem:[%s400_s3 + $0x20] sm:$0xff]  ;;  %v113_v15 = vld [vmem:[%s400_s3 + $0x28] sm:$0xff]  ;;  %vm33_vm1 = vcmask 261120   ;;  %vm123_vm2 = vcmask 523264  }
   0x7   :  { %269 = vmatprep.subr.bf16.mxu1 %v306_v3  ;;  %v21_v16 = vld [vmem:[%s397_s0] sm:$0xff]  ;;  %v273_v17 = vpack.c.bf16 %v113_v15, %v112_v14  ;;  %v114_v18 = vld [vmem:[%s400_s3 + $0x30] sm:$0xff]  ;;  %v115_v19 = vld [vmem:[%s400_s3 + $0x38] sm:$0xff]  ;;  %s309_s21 = smov [#allocation2]  }
   0x8   :  { %265 = vmatpush3.bf16.msra.mxu0 %v264_v11  ;;  %v276_v20 = vpack.c.bf16 %v115_v19, %v114_v18  ;;  %v212_v21 = vld [vmem:[%s399_s2] ss:$0 sm:$0xff]  ;;  %s204_s22 = sshll.u32 %s309_s21, 4  ;;  %s205_s22 = int_to_ptr.vmem [resolvable:$true] %s204_s22 }
   0x9   :  { %v214_v26 = vld [vmem:[%s401_s4] ss:$0 sm:$0xff]  ;;  %s282_s3 = scalar_lea.vmem %s205_s22, 128  ;;  %p287_p1 = scmp.lt.s32.totalorder %s205_s22, %s205_s22 }
   0xa   :  { %271 = vmatpush3.bf16.msra.mxu1 %v270_v13  ;;  %p283_p0 = scmp.ne.s32.totalorder %s205_s22, %s282_s3  ;;  %p288_p2 = scmp.lt.s32.totalorder %s282_s3, %s282_s3 }
   0xb   :  { %239 = vmatmul.mubr.msk.f32.vlgmr.msra.gmra.mrb[0].mxu0 %vm33_vm1, %v21_v16  ;;  %272 = vmatprep.subr.bf16.mxu1 %v306_v3 }
   0xc   :  { %p289_p3 = por %p288_p2, %p287_p1 }
   0xe   :  { %274 = vmatpush3.bf16.msra.mxu1 %v273_v17  ;;  %p290_p4 = pnand %p289_p3, %p283_p0 }
   0xf   :  { %275 = vmatprep.subr.bf16.mxu1 %v306_v3 }
  0x12   :  { %277 = vmatpush3.bf16.msra.mxu1 %v276_v20 }
  0xde   :  { %v103_v22 = vpop.f32.mrb[0].mxu0 }
  0xdf   :  { %v104_v23 = vadd.f32 %v212_v21, %v103_v22  ;;  %v240_v24 = vpop.f32.mrb[1].mxu0 }
  0xe1   :  { %v107_v25 = vmax.f32 %v104_v23, 0.0 }
  0xe3   :  { %258 = vmatmul.mubr.msk.f32.vlgmr.msra.gmra.mrb[0].mxu1 %vm123_vm2, %v107_v25 }
 0x1b6   :  { %v193_v27 = vpop.f32.mrb[0].mxu1 }
 0x1b7   :  { %v194_v28 = vadd.f32 %v214_v26, %v193_v27  ;;  %v259_v29 = vpop.f32.mrb[1].mxu1 }
 0x1b9   :  { %197 = vst [vmem:[#allocation2] sm:$0xff] %v194_v28 }
 0x1ba   :  { %293 = shalt.err (!%p290_p4)
}
 0x1bb   :  { %s294_s24 = scalar_lea.hbm %s402_s5, 128 }
 0x1bc   :  { %p295_p5 = scmp.ne.s32.totalorder %s402_s5, %s294_s24  ;;  %p298_p6 = scmp.lt.u32.totalorder %s294_s24, %s402_s5 }
 0x1be   :  { %p300_p7 = pnand %p298_p6, %p295_p5 }
 0x1c0   :  { %303 = shalt.err (!%p300_p7)
}
 0x1c1   :  { %207 = dma.vmem_to_hbm [thread:$0]  %s205_s22, 128, %s402_s5, [#allocation3]  }
 0x1c2   :  { %304 = dma.done.wait [#allocation3], 128  }
 0x1c3   :  { %305 = vsyncadd [#allocation3], 4294967168 }
 0x1c4   :  { %211 = vsyncpa [#allocation3], 1 }

</bundles_post_ra>
